<compile_context>
chip_gen: v7x
topology: tpu7x:2x2x1
jax: 0.10.0
libtpu: 0.0.40
codegen_flags: <defaults>
</compile_context>

<pallas_src>
import functools

import jax
import jax.numpy as jnp
from jax.experimental import pallas as pl
from jax.experimental.pallas import tpu as pltpu


def _enn_kernel(adj_ref, out_ref, *, epsilon, set_value):
    a = adj_ref[...]
    # Compare in f32 for exact parity with the torch (float) reference even
    # when adj is a narrower dtype.
    mask = a.astype(jnp.float32) > jnp.float32(epsilon)
    if set_value is None:
        kept = a
    else:
        kept = jnp.full_like(a, set_value)
    out_ref[...] = jnp.where(mask, kept, jnp.zeros_like(a))


def _pick_blocks(n_rows, n_cols, itemsize, target_block_bytes, max_rows_per_block):
    """Pick (tm, tn): lane-dense blocks of roughly target_block_bytes."""
    # Preferred path: full-width row bands (lane-dense, 1-D grid).
    bytes_per_row = max(n_cols * itemsize, 1)
    if 8 * bytes_per_row <= 2 * target_block_bytes:
        tm = max(target_block_bytes // bytes_per_row, 8)
        if max_rows_per_block is not None:
            tm = min(tm, max(max_rows_per_block, 8))
        tm = max((tm // 8) * 8, 8)              # sublane alignment
        tm = min(tm, n_rows) if tm >= n_rows else tm
        if tm >= n_rows:
            tm = n_rows                         # full-dim block is always legal
        return tm, n_cols
    # Fallback for extremely wide rows: tile columns too (128-aligned lanes).
    tn = max((target_block_bytes // (8 * itemsize)) // 128 * 128, 128)
    tn = n_cols if tn >= n_cols else tn
    tm = 8 if n_rows > 8 else n_rows
    if max_rows_per_block is not None and tm > max(max_rows_per_block, 8):
        tm = max(max_rows_per_block, 8)
    return tm, tn


def epsilon_nn(adj, epsilon, set_value=None, *,
               target_block_bytes=4 * 1024 * 1024,
               max_rows_per_block=None):
    """Dense EpsilonNN forward: threshold elements of `adj` at `epsilon`."""
    assert adj.ndim == 2, "dense adjacency must be 2-D"
    n_rows, n_cols = adj.shape
    itemsize = jnp.dtype(adj.dtype).itemsize

    tm, tn = _pick_blocks(n_rows, n_cols, itemsize,
                          target_block_bytes, max_rows_per_block)

    kernel = functools.partial(_enn_kernel, epsilon=epsilon, set_value=set_value)

    # Double-buffered input + output blocks plus headroom; clamp between the
    # default scoped limit and a cross-generation-safe ceiling (< 64 MiB).
    block_bytes = tm * tn * itemsize
    vmem_limit = min(max(4 * block_bytes + (4 << 20), 32 << 20), 56 << 20)

    if tn == n_cols:
        grid = (pl.cdiv(n_rows, tm),)
        in_specs = [pl.BlockSpec((tm, n_cols), lambda i: (i, 0))]
        out_specs = pl.BlockSpec((tm, n_cols), lambda i: (i, 0))
        dim_sem = ("parallel",)
    else:
        grid = (pl.cdiv(n_rows, tm), pl.cdiv(n_cols, tn))
        in_specs = [pl.BlockSpec((tm, tn), lambda i, j: (i, j))]
        out_specs = pl.BlockSpec((tm, tn), lambda i, j: (i, j))
        dim_sem = ("parallel", "parallel")

    return pl.pallas_call(
        kernel,
        out_shape=jax.ShapeDtypeStruct(adj.shape, adj.dtype),
        grid_spec=pltpu.PrefetchScalarGridSpec(
            num_scalar_prefetch=0,
            grid=grid,
            in_specs=in_specs,
            out_specs=out_specs,
        ),
        compiler_params=pltpu.CompilerParams(
            dimension_semantics=dim_sem,
            vmem_limit_bytes=int(vmem_limit),
        ),
    )(adj)


def _reference(adj, epsilon, set_value=None):
    mask = (adj > epsilon).astype(adj.dtype)
    if set_value is None:
        return adj * mask
    return mask * jnp.asarray(set_value, dtype=adj.dtype)


if __name__ == "__main__":
    key = jax.random.PRNGKey(0)

    # Case 1/2: small square adjacency, keep-original and set-value variants.
    n = 256
    adj = jax.random.uniform(key, (n, n), dtype=jnp.float32)
    epsilon = 0.5

    out_keep = jax.block_until_ready(epsilon_nn(adj, epsilon, set_value=None))
    assert jnp.allclose(out_keep, _reference(adj, epsilon, None)), \
        "mismatch (set_value=None)"

    out_set = jax.block_until_ready(epsilon_nn(adj, epsilon, set_value=1.0))
    assert jnp.allclose(out_set, _reference(adj, epsilon, 1.0)), \
        "mismatch (set_value=1.0)"

    # Case 3: non-divisible shape + forced multi-block grid to exercise the
    # cdiv / ragged-last-band path (200 rows, 64-row bands -> 4 blocks,
    # last one partial).
    key2 = jax.random.PRNGKey(1)
    adj_ragged = jax.random.uniform(key2, (200, 160), dtype=jnp.float32)
    out_ragged = jax.block_until_ready(
        epsilon_nn(adj_ragged, epsilon, set_value=None, max_rows_per_block=64))
    assert jnp.allclose(out_ragged, _reference(adj_ragged, epsilon, None)), \
        "mismatch (ragged shape)"

    # Case 4: bf16 input to confirm the f32-comparison parity path.
    adj_bf16 = jax.random.uniform(jax.random.PRNGKey(2), (128, 256),
                                  dtype=jnp.float32).astype(jnp.bfloat16)
    out_bf16 = jax.block_until_ready(epsilon_nn(adj_bf16, epsilon, set_value=2.0))
    assert jnp.allclose(out_bf16.astype(jnp.float32),
                        _reference(adj_bf16, epsilon, 2.0).astype(jnp.float32)), \
        "mismatch (bf16, set_value=2.0)"

    print("KERNEL_OK")
</pallas_src>

<mosaic_0001>
module attributes {stable_mosaic.version = 11 : i64} {
  func.func @_enn_kernel(%arg0: i32, %arg1: memref<256x256xf32, #tpu.memory_space<vmem>>, %arg2: memref<256x256xf32, #tpu.memory_space<vmem>>) attributes {dimension_semantics = [#tpu.dimension_semantics<parallel>], iteration_bounds = array<i64: 1>, scalar_prefetch = 0 : i64, scratch_operands = 0 : i64, tpu.core_type = #tpu.core_type<tc>, window_params = [{transform_indices = @transform_0, window_bounds = array<i64: 256, 256>}, {transform_indices = @transform_1, window_bounds = array<i64: 256, 256>}]} {
    %c0 = arith.constant 0 : index
    %c0_0 = arith.constant 0 : index
    %0 = vector.load %arg1[%c0, %c0_0] : memref<256x256xf32, #tpu.memory_space<vmem>>, vector<256x256xf32>
    %cst = arith.constant 5.000000e-01 : f32
    %1 = vector.broadcast %cst : f32 to vector<256x256xf32>
    %2 = arith.cmpf ogt, %0, %1 : vector<256x256xf32>
    %cst_1 = arith.constant 0.000000e+00 : f32
    %3 = vector.broadcast %cst_1 : f32 to vector<256x256xf32>
    %4 = arith.select %2, %0, %3 : vector<256x256xi1>, vector<256x256xf32>
    %c0_2 = arith.constant 0 : index
    %c0_3 = arith.constant 0 : index
    %5 = vector.load %arg2[%c0_2, %c0_3] : memref<256x256xf32, #tpu.memory_space<vmem>>, vector<256x256xf32>
    tpu.vector_store %arg2[%c0_2, %c0_3], %4 {strides = array<i32>} : memref<256x256xf32, #tpu.memory_space<vmem>>, vector<256x256xf32>,
    return
  }
  func.func @transform_0(%arg0: i32) -> (i32, i32) {
    %c0_i32 = arith.constant 0 : i32
    %c0_i32_0 = arith.constant 0 : i32
    return %arg0, %c0_i32 : i32, i32
  }
  func.func @transform_1(%arg0: i32) -> (i32, i32) {
    %c0_i32 = arith.constant 0 : i32
    %c0_i32_0 = arith.constant 0 : i32
    return %arg0, %c0_i32 : i32, i32
  }
}

</mosaic_0001>

<bundles_post_ra>
// kernel: tpu_custom_call.1
= control target key start
LH: loop header
LB: loop body
LE: loop exit
PB: predicated region body
PF: predicated region fallthrough
CT: control target
= control target key end

     0   :  { %6 = vsyncpa [#allocation3], 0  ;;  %s395_s0 = inlined_call_operand.hbm [shape: f32[256,256], index: 0, kind: input, shape index: {}]   ;;  %s396_s1 = inlined_call_operand.hbm [shape: f32[256,256], index: 1, kind: output, shape index: {}]  }
   0x1   :  { %7 = vsyncpa [#allocation4], 0  ;;  %s348_s6 = smov [#allocation2]   ;;  %s300_s10 = scalar_lea.hbm %s395_s0, 8192 }
   0x2   :  { %s13_s7 = sshll.u32 %s348_s6, 4  ;;  %p301_p0 = scmp.ne.s32.totalorder %s395_s0, %s300_s10  ;;  %s14_s7 = int_to_ptr.vmem [resolvable:$true] %s13_s7 }
   0x3   :  { %p304_p1 = scmp.lt.u32.totalorder %s300_s10, %s395_s0 }
   0x5   :  { %p306_p2 = pnand %p304_p1, %p301_p0 }
   0x7   :  { %309 = shalt.err (!%p306_p2)
}
   0x8   :  { %s310_s15 = scalar_lea.vmem %s14_s7, 8192  ;;  %p315_p4 = scmp.lt.s32.totalorder %s14_s7, %s14_s7 }
   0x9   :  { %p311_p3 = scmp.ne.s32.totalorder %s14_s7, %s310_s15  ;;  %p316_p5 = scmp.lt.s32.totalorder %s310_s15, %s310_s15 }
   0xb   :  { %p317_p6 = por %p316_p5, %p315_p4 }
   0xd   :  { %p318_p7 = pnand %p317_p6, %p311_p3 }
   0xf   :  { %321 = shalt.err (!%p318_p7)
}
  0x10   :  { %s349_s16 = smov 256   ;;  %s350_s17 = smov 16  }
  0x11   :  { %19 = dma.hbm_to_vmem [thread:$0]  %s395_s0, 8192, %s14_s7, [#allocation3], %s349_s16, %s349_s16, %s350_s17  }
  0x12   :  { %344 = dma.done.wait [#allocation3], 8192  }
  0x13   :  { %345 = vsyncadd [#allocation3], 4294959104  ;;  %v23_v0 = vld [vmem:[#allocation2] sm:$0xff]  ;;  %v24_v1 = vld [vmem:[#allocation2 + $0x8] sm:$0xff]  ;;  %s351_s20 = smov [#allocation5]  }
  0x14   :  { %v25_v2 = vld [vmem:[#allocation2 + $0x10] sm:$0xff]  ;;  %s377_s21 = sshll.u32 %s351_s20, 4  ;;  %vm87_vm0 = vcmp.gt.f32.partialorder %v23_v0, 0.5  ;;  %vm88_vm1 = vcmp.gt.f32.partialorder %v24_v1, 0.5  ;;  %v26_v3 = vld [vmem:[#allocation2 + $0x18] sm:$0xff]  ;;  %v27_v4 = vld [vmem:[#allocation2 + $0x20] sm:$0xff]  ;;  %s285_s21 = int_to_ptr.vmem [resolvable:$true] %s377_s21 }
  0x15   :  { %vm89_vm2 = vcmp.gt.f32.partialorder %v25_v2, 0.5  ;;  %v28_v5 = vld [vmem:[#allocation2 + $0x28] sm:$0xff]  ;;  %v151_v6 = vsel %vm87_vm0, %v23_v0, 0.0  ;;  %v152_v7 = vsel %vm88_vm1, %v24_v1, 0.0  ;;  %vm90_vm3 = vcmp.gt.f32.partialorder %v26_v3, 0.5  ;;  %v29_v9 = vld [vmem:[#allocation2 + $0x30] sm:$0xff]  ;;  %p327_p9 = scmp.lt.s32.totalorder %s285_s21, %s285_s21 }
  0x16   :  { %v153_v8 = vsel %vm89_vm2, %v25_v2, 0.0  ;;  %v30_v10 = vld [vmem:[#allocation2 + $0x38] sm:$0xff]  ;;  %215 = vst [vmem:[#allocation5] sm:$0xff] %v151_v6  ;;  %216 = vst [vmem:[#allocation5 + $0x8] sm:$0xff] %v152_v7  ;;  %v154_v11 = vsel %vm90_vm3, %v26_v3, 0.0  ;;  %vm91_vm4 = vcmp.gt.f32.partialorder %v27_v4, 0.5 }
  0x17   :  { %217 = vst [vmem:[#allocation5 + $0x10] sm:$0xff] %v153_v8  ;;  %vm92_vm5 = vcmp.gt.f32.partialorder %v28_v5, 0.5  ;;  %vm93_vm6 = vcmp.gt.f32.partialorder %v29_v9, 0.5  ;;  %v31_v12 = vld [vmem:[#allocation2 + $0x40] sm:$0xff]  ;;  %v32_v13 = vld [vmem:[#allocation2 + $0x48] sm:$0xff]  ;;  %218 = vst [vmem:[#allocation5 + $0x18] sm:$0xff] %v154_v11 }
  0x18   :  { %v155_v14 = vsel %vm91_vm4, %v27_v4, 0.0  ;;  %v156_v15 = vsel %vm92_vm5, %v28_v5, 0.0  ;;  %v157_v16 = vsel %vm93_vm6, %v29_v9, 0.0  ;;  %vm94_vm7 = vcmp.gt.f32.partialorder %v30_v10, 0.5  ;;  %v33_v17 = vld [vmem:[#allocation2 + $0x50] sm:$0xff]  ;;  %v34_v18 = vld [vmem:[#allocation2 + $0x58] sm:$0xff] }
  0x19   :  { %219 = vst [vmem:[#allocation5 + $0x20] sm:$0xff] %v155_v14  ;;  %220 = vst [vmem:[#allocation5 + $0x28] sm:$0xff] %v156_v15  ;;  %v158_v19 = vsel %vm94_vm7, %v30_v10, 0.0  ;;  %vm95_vm8 = vcmp.gt.f32.partialorder %v31_v12, 0.5  ;;  %vm96_vm9 = vcmp.gt.f32.partialorder %v32_v13, 0.5  ;;  %vm97_vm10 = vcmp.gt.f32.partialorder %v33_v17, 0.5 }
  0x1a   :  { %221 = vst [vmem:[#allocation5 + $0x30] sm:$0xff] %v157_v16  ;;  %v35_v20 = vld [vmem:[#allocation2 + $0x60] sm:$0xff]  ;;  %v36_v21 = vld [vmem:[#allocation2 + $0x68] sm:$0xff]  ;;  %222 = vst [vmem:[#allocation5 + $0x38] sm:$0xff] %v158_v19  ;;  %v159_v22 = vsel %vm95_vm8, %v31_v12, 0.0  ;;  %v160_v23 = vsel %vm96_vm9, %v32_v13, 0.0 }
  0x1b   :  { %v161_v24 = vsel %vm97_vm10, %v33_v17, 0.0  ;;  %vm98_vm11 = vcmp.gt.f32.partialorder %v34_v18, 0.5  ;;  %v37_v25 = vld [vmem:[#allocation2 + $0x70] sm:$0xff]  ;;  %v38_v26 = vld [vmem:[#allocation2 + $0x78] sm:$0xff]  ;;  %223 = vst [vmem:[#allocation5 + $0x40] sm:$0xff] %v159_v22  ;;  %224 = vst [vmem:[#allocation5 + $0x48] sm:$0xff] %v160_v23 }
  0x1c   :  { %225 = vst [vmem:[#allocation5 + $0x50] sm:$0xff] %v161_v24  ;;  %v162_v27 = vsel %vm98_vm11, %v34_v18, 0.0  ;;  %vm99_vm12 = vcmp.gt.f32.partialorder %v35_v20, 0.5  ;;  %vm100_vm13 = vcmp.gt.f32.partialorder %v36_v21, 0.5  ;;  %vm101_vm14 = vcmp.gt.f32.partialorder %v37_v25, 0.5  ;;  %v39_v28 = vld [vmem:[#allocation2 + $0x80] sm:$0xff] }
  0x1d   :  { %v40_v29 = vld [vmem:[#allocation2 + $0x88] sm:$0xff]  ;;  %226 = vst [vmem:[#allocation5 + $0x58] sm:$0xff] %v162_v27  ;;  %v163_v30 = vsel %vm99_vm12, %v35_v20, 0.0  ;;  %v164_v31 = vsel %vm100_vm13, %v36_v21, 0.0  ;;  %v165_v32 = vsel %vm101_vm14, %v37_v25, 0.0  ;;  %vm102_vm15 = vcmp.gt.f32.partialorder %v38_v26, 0.5 }
  0x1e   :  { %v41_v33 = vld [vmem:[#allocation2 + $0x90] sm:$0xff]  ;;  %v42_v34 = vld [vmem:[#allocation2 + $0x98] sm:$0xff]  ;;  %227 = vst [vmem:[#allocation5 + $0x60] sm:$0xff] %v163_v30  ;;  %228 = vst [vmem:[#allocation5 + $0x68] sm:$0xff] %v164_v31  ;;  %v166_v35 = vsel %vm102_vm15, %v38_v26, 0.0  ;;  %vm103_vm0 = vcmp.gt.f32.partialorder %v39_v28, 0.5 }
  0x1f   :  { %229 = vst [vmem:[#allocation5 + $0x70] sm:$0xff] %v165_v32  ;;  %vm104_vm1 = vcmp.gt.f32.partialorder %v40_v29, 0.5  ;;  %vm105_vm2 = vcmp.gt.f32.partialorder %v41_v33, 0.5  ;;  %v43_v36 = vld [vmem:[#allocation2 + $0xa0] sm:$0xff]  ;;  %v44_v37 = vld [vmem:[#allocation2 + $0xa8] sm:$0xff]  ;;  %230 = vst [vmem:[#allocation5 + $0x78] sm:$0xff] %v166_v35 }
  0x20   :  { %v167_v38 = vsel %vm103_vm0, %v39_v28, 0.0  ;;  %v168_v39 = vsel %vm104_vm1, %v40_v29, 0.0  ;;  %v169_v40 = vsel %vm105_vm2, %v41_v33, 0.0  ;;  %vm106_vm3 = vcmp.gt.f32.partialorder %v42_v34, 0.5  ;;  %v45_v41 = vld [vmem:[#allocation2 + $0xb0] sm:$0xff]  ;;  %v46_v42 = vld [vmem:[#allocation2 + $0xb8] sm:$0xff] }
  0x21   :  { %231 = vst [vmem:[#allocation5 + $0x80] sm:$0xff] %v167_v38  ;;  %232 = vst [vmem:[#allocation5 + $0x88] sm:$0xff] %v168_v39  ;;  %v170_v43 = vsel %vm106_vm3, %v42_v34, 0.0  ;;  %vm107_vm4 = vcmp.gt.f32.partialorder %v43_v36, 0.5  ;;  %vm108_vm5 = vcmp.gt.f32.partialorder %v44_v37, 0.5  ;;  %vm109_vm6 = vcmp.gt.f32.partialorder %v45_v41, 0.5 }
  0x22   :  { %233 = vst [vmem:[#allocation5 + $0x90] sm:$0xff] %v169_v40  ;;  %v47_v44 = vld [vmem:[#allocation2 + $0xc0] sm:$0xff]  ;;  %v48_v45 = vld [vmem:[#allocation2 + $0xc8] sm:$0xff]  ;;  %234 = vst [vmem:[#allocation5 + $0x98] sm:$0xff] %v170_v43  ;;  %v171_v46 = vsel %vm107_vm4, %v43_v36, 0.0  ;;  %v172_v47 = vsel %vm108_vm5, %v44_v37, 0.0 }
  0x23   :  { %v173_v48 = vsel %vm109_vm6, %v45_v41, 0.0  ;;  %vm110_vm7 = vcmp.gt.f32.partialorder %v46_v42, 0.5  ;;  %v49_v49 = vld [vmem:[#allocation2 + $0xd0] sm:$0xff]  ;;  %v50_v50 = vld [vmem:[#allocation2 + $0xd8] sm:$0xff]  ;;  %235 = vst [vmem:[#allocation5 + $0xa0] sm:$0xff] %v171_v46  ;;  %236 = vst [vmem:[#allocation5 + $0xa8] sm:$0xff] %v172_v47 }
  0x24   :  { %237 = vst [vmem:[#allocation5 + $0xb0] sm:$0xff] %v173_v48  ;;  %v174_v51 = vsel %vm110_vm7, %v46_v42, 0.0  ;;  %vm111_vm8 = vcmp.gt.f32.partialorder %v47_v44, 0.5  ;;  %vm112_vm9 = vcmp.gt.f32.partialorder %v48_v45, 0.5  ;;  %vm113_vm10 = vcmp.gt.f32.partialorder %v49_v49, 0.5  ;;  %v51_v52 = vld [vmem:[#allocation2 + $0xe0] sm:$0xff] }
  0x25   :  { %v52_v53 = vld [vmem:[#allocation2 + $0xe8] sm:$0xff]  ;;  %238 = vst [vmem:[#allocation5 + $0xb8] sm:$0xff] %v174_v51  ;;  %v175_v54 = vsel %vm111_vm8, %v47_v44, 0.0  ;;  %v176_v55 = vsel %vm112_vm9, %v48_v45, 0.0  ;;  %v177_v56 = vsel %vm113_vm10, %v49_v49, 0.0  ;;  %vm114_vm11 = vcmp.gt.f32.partialorder %v50_v50, 0.5 }
  0x26   :  { %v53_v57 = vld [vmem:[#allocation2 + $0xf0] sm:$0xff]  ;;  %v54_v58 = vld [vmem:[#allocation2 + $0xf8] sm:$0xff]  ;;  %239 = vst [vmem:[#allocation5 + $0xc0] sm:$0xff] %v175_v54  ;;  %240 = vst [vmem:[#allocation5 + $0xc8] sm:$0xff] %v176_v55  ;;  %v178_v59 = vsel %vm114_vm11, %v50_v50, 0.0  ;;  %vm115_vm12 = vcmp.gt.f32.partialorder %v51_v52, 0.5 }
  0x27   :  { %241 = vst [vmem:[#allocation5 + $0xd0] sm:$0xff] %v177_v56  ;;  %vm116_vm13 = vcmp.gt.f32.partialorder %v52_v53, 0.5  ;;  %vm117_vm14 = vcmp.gt.f32.partialorder %v53_v57, 0.5  ;;  %v55_v60 = vld [vmem:[#allocation2 + $0x100] sm:$0xff]  ;;  %v56_v61 = vld [vmem:[#allocation2 + $0x108] sm:$0xff]  ;;  %242 = vst [vmem:[#allocation5 + $0xd8] sm:$0xff] %v178_v59 }
  0x28   :  { %v179_v62 = vsel %vm115_vm12, %v51_v52, 0.0  ;;  %v180_v63 = vsel %vm116_vm13, %v52_v53, 0.0  ;;  %v181_v0 = vsel %vm117_vm14, %v53_v57, 0.0  ;;  %vm118_vm15 = vcmp.gt.f32.partialorder %v54_v58, 0.5  ;;  %v57_v1 = vld [vmem:[#allocation2 + $0x110] sm:$0xff]  ;;  %v58_v2 = vld [vmem:[#allocation2 + $0x118] sm:$0xff] }
  0x29   :  { %243 = vst [vmem:[#allocation5 + $0xe0] sm:$0xff] %v179_v62  ;;  %244 = vst [vmem:[#allocation5 + $0xe8] sm:$0xff] %v180_v63  ;;  %v182_v3 = vsel %vm118_vm15, %v54_v58, 0.0  ;;  %vm119_vm0 = vcmp.gt.f32.partialorder %v55_v60, 0.5  ;;  %vm120_vm1 = vcmp.gt.f32.partialorder %v56_v61, 0.5  ;;  %vm121_vm2 = vcmp.gt.f32.partialorder %v57_v1, 0.5 }
  0x2a   :  { %245 = vst [vmem:[#allocation5 + $0xf0] sm:$0xff] %v181_v0  ;;  %v59_v4 = vld [vmem:[#allocation2 + $0x120] sm:$0xff]  ;;  %v60_v5 = vld [vmem:[#allocation2 + $0x128] sm:$0xff]  ;;  %246 = vst [vmem:[#allocation5 + $0xf8] sm:$0xff] %v182_v3  ;;  %v183_v6 = vsel %vm119_vm0, %v55_v60, 0.0  ;;  %v184_v7 = vsel %vm120_vm1, %v56_v61, 0.0 }
  0x2b   :  { %v185_v8 = vsel %vm121_vm2, %v57_v1, 0.0  ;;  %vm122_vm3 = vcmp.gt.f32.partialorder %v58_v2, 0.5  ;;  %v61_v9 = vld [vmem:[#allocation2 + $0x130] sm:$0xff]  ;;  %v62_v10 = vld [vmem:[#allocation2 + $0x138] sm:$0xff]  ;;  %247 = vst [vmem:[#allocation5 + $0x100] sm:$0xff] %v183_v6  ;;  %248 = vst [vmem:[#allocation5 + $0x108] sm:$0xff] %v184_v7 }
  0x2c   :  { %249 = vst [vmem:[#allocation5 + $0x110] sm:$0xff] %v185_v8  ;;  %v186_v11 = vsel %vm122_vm3, %v58_v2, 0.0  ;;  %vm123_vm4 = vcmp.gt.f32.partialorder %v59_v4, 0.5  ;;  %vm124_vm5 = vcmp.gt.f32.partialorder %v60_v5, 0.5  ;;  %vm125_vm6 = vcmp.gt.f32.partialorder %v61_v9, 0.5  ;;  %v63_v12 = vld [vmem:[#allocation2 + $0x140] sm:$0xff] }
  0x2d   :  { %v64_v13 = vld [vmem:[#allocation2 + $0x148] sm:$0xff]  ;;  %250 = vst [vmem:[#allocation5 + $0x118] sm:$0xff] %v186_v11  ;;  %v187_v14 = vsel %vm123_vm4, %v59_v4, 0.0  ;;  %v188_v15 = vsel %vm124_vm5, %v60_v5, 0.0  ;;  %v189_v16 = vsel %vm125_vm6, %v61_v9, 0.0  ;;  %vm126_vm7 = vcmp.gt.f32.partialorder %v62_v10, 0.5 }
  0x2e   :  { %v65_v17 = vld [vmem:[#allocation2 + $0x150] sm:$0xff]  ;;  %v66_v18 = vld [vmem:[#allocation2 + $0x158] sm:$0xff]  ;;  %251 = vst [vmem:[#allocation5 + $0x120] sm:$0xff] %v187_v14  ;;  %252 = vst [vmem:[#allocation5 + $0x128] sm:$0xff] %v188_v15  ;;  %v190_v19 = vsel %vm126_vm7, %v62_v10, 0.0  ;;  %vm127_vm8 = vcmp.gt.f32.partialorder %v63_v12, 0.5 }
  0x2f   :  { %253 = vst [vmem:[#allocation5 + $0x130] sm:$0xff] %v189_v16  ;;  %vm128_vm9 = vcmp.gt.f32.partialorder %v64_v13, 0.5  ;;  %vm129_vm10 = vcmp.gt.f32.partialorder %v65_v17, 0.5  ;;  %v67_v20 = vld [vmem:[#allocation2 + $0x160] sm:$0xff]  ;;  %v68_v21 = vld [vmem:[#allocation2 + $0x168] sm:$0xff]  ;;  %254 = vst [vmem:[#allocation5 + $0x138] sm:$0xff] %v190_v19 }
  0x30   :  { %v191_v22 = vsel %vm127_vm8, %v63_v12, 0.0  ;;  %v192_v23 = vsel %vm128_vm9, %v64_v13, 0.0  ;;  %v193_v24 = vsel %vm129_vm10, %v65_v17, 0.0  ;;  %vm130_vm11 = vcmp.gt.f32.partialorder %v66_v18, 0.5  ;;  %v69_v25 = vld [vmem:[#allocation2 + $0x170] sm:$0xff]  ;;  %v70_v26 = vld [vmem:[#allocation2 + $0x178] sm:$0xff] }
  0x31   :  { %255 = vst [vmem:[#allocation5 + $0x140] sm:$0xff] %v191_v22  ;;  %256 = vst [vmem:[#allocation5 + $0x148] sm:$0xff] %v192_v23  ;;  %v194_v27 = vsel %vm130_vm11, %v66_v18, 0.0  ;;  %vm131_vm12 = vcmp.gt.f32.partialorder %v67_v20, 0.5  ;;  %vm132_vm13 = vcmp.gt.f32.partialorder %v68_v21, 0.5  ;;  %vm133_vm14 = vcmp.gt.f32.partialorder %v69_v25, 0.5 }
  0x32   :  { %257 = vst [vmem:[#allocation5 + $0x150] sm:$0xff] %v193_v24  ;;  %v71_v28 = vld [vmem:[#allocation2 + $0x180] sm:$0xff]  ;;  %v72_v29 = vld [vmem:[#allocation2 + $0x188] sm:$0xff]  ;;  %258 = vst [vmem:[#allocation5 + $0x158] sm:$0xff] %v194_v27  ;;  %v195_v30 = vsel %vm131_vm12, %v67_v20, 0.0  ;;  %v196_v31 = vsel %vm132_vm13, %v68_v21, 0.0 }
  0x33   :  { %v197_v32 = vsel %vm133_vm14, %v69_v25, 0.0  ;;  %vm134_vm15 = vcmp.gt.f32.partialorder %v70_v26, 0.5  ;;  %v73_v33 = vld [vmem:[#allocation2 + $0x190] sm:$0xff]  ;;  %v74_v34 = vld [vmem:[#allocation2 + $0x198] sm:$0xff]  ;;  %259 = vst [vmem:[#allocation5 + $0x160] sm:$0xff] %v195_v30  ;;  %260 = vst [vmem:[#allocation5 + $0x168] sm:$0xff] %v196_v31 }
  0x34   :  { %261 = vst [vmem:[#allocation5 + $0x170] sm:$0xff] %v197_v32  ;;  %v198_v35 = vsel %vm134_vm15, %v70_v26, 0.0  ;;  %vm135_vm0 = vcmp.gt.f32.partialorder %v71_v28, 0.5  ;;  %vm136_vm1 = vcmp.gt.f32.partialorder %v72_v29, 0.5  ;;  %vm137_vm2 = vcmp.gt.f32.partialorder %v73_v33, 0.5  ;;  %v75_v36 = vld [vmem:[#allocation2 + $0x1a0] sm:$0xff] }
  0x35   :  { %v76_v37 = vld [vmem:[#allocation2 + $0x1a8] sm:$0xff]  ;;  %262 = vst [vmem:[#allocation5 + $0x178] sm:$0xff] %v198_v35  ;;  %v199_v38 = vsel %vm135_vm0, %v71_v28, 0.0  ;;  %v200_v39 = vsel %vm136_vm1, %v72_v29, 0.0  ;;  %v201_v40 = vsel %vm137_vm2, %v73_v33, 0.0  ;;  %vm138_vm3 = vcmp.gt.f32.partialorder %v74_v34, 0.5 }
  0x36   :  { %v77_v41 = vld [vmem:[#allocation2 + $0x1b0] sm:$0xff]  ;;  %v78_v42 = vld [vmem:[#allocation2 + $0x1b8] sm:$0xff]  ;;  %263 = vst [vmem:[#allocation5 + $0x180] sm:$0xff] %v199_v38  ;;  %264 = vst [vmem:[#allocation5 + $0x188] sm:$0xff] %v200_v39  ;;  %v202_v43 = vsel %vm138_vm3, %v74_v34, 0.0  ;;  %vm139_vm4 = vcmp.gt.f32.partialorder %v75_v36, 0.5 }
  0x37   :  { %265 = vst [vmem:[#allocation5 + $0x190] sm:$0xff] %v201_v40  ;;  %vm140_vm5 = vcmp.gt.f32.partialorder %v76_v37, 0.5  ;;  %vm141_vm6 = vcmp.gt.f32.partialorder %v77_v41, 0.5  ;;  %v79_v44 = vld [vmem:[#allocation2 + $0x1c0] sm:$0xff]  ;;  %v80_v45 = vld [vmem:[#allocation2 + $0x1c8] sm:$0xff]  ;;  %266 = vst [vmem:[#allocation5 + $0x198] sm:$0xff] %v202_v43 }
  0x38   :  { %v203_v46 = vsel %vm139_vm4, %v75_v36, 0.0  ;;  %v204_v47 = vsel %vm140_vm5, %v76_v37, 0.0  ;;  %v205_v48 = vsel %vm141_vm6, %v77_v41, 0.0  ;;  %vm142_vm7 = vcmp.gt.f32.partialorder %v78_v42, 0.5  ;;  %v81_v49 = vld [vmem:[#allocation2 + $0x1d0] sm:$0xff]  ;;  %v82_v50 = vld [vmem:[#allocation2 + $0x1d8] sm:$0xff] }
  0x39   :  { %267 = vst [vmem:[#allocation5 + $0x1a0] sm:$0xff] %v203_v46  ;;  %268 = vst [vmem:[#allocation5 + $0x1a8] sm:$0xff] %v204_v47  ;;  %v206_v51 = vsel %vm142_vm7, %v78_v42, 0.0  ;;  %vm143_vm8 = vcmp.gt.f32.partialorder %v79_v44, 0.5  ;;  %vm144_vm9 = vcmp.gt.f32.partialorder %v80_v45, 0.5  ;;  %vm145_vm10 = vcmp.gt.f32.partialorder %v81_v49, 0.5 }
  0x3a   :  { %269 = vst [vmem:[#allocation5 + $0x1b0] sm:$0xff] %v205_v48  ;;  %v83_v52 = vld [vmem:[#allocation2 + $0x1e0] sm:$0xff]  ;;  %v84_v53 = vld [vmem:[#allocation2 + $0x1e8] sm:$0xff]  ;;  %270 = vst [vmem:[#allocation5 + $0x1b8] sm:$0xff] %v206_v51  ;;  %v207_v54 = vsel %vm143_vm8, %v79_v44, 0.0  ;;  %v208_v55 = vsel %vm144_vm9, %v80_v45, 0.0 }
  0x3b   :  { %v209_v56 = vsel %vm145_vm10, %v81_v49, 0.0  ;;  %vm146_vm11 = vcmp.gt.f32.partialorder %v82_v50, 0.5  ;;  %v85_v57 = vld [vmem:[#allocation2 + $0x1f0] sm:$0xff]  ;;  %v86_v58 = vld [vmem:[#allocation2 + $0x1f8] sm:$0xff]  ;;  %271 = vst [vmem:[#allocation5 + $0x1c0] sm:$0xff] %v207_v54  ;;  %272 = vst [vmem:[#allocation5 + $0x1c8] sm:$0xff] %v208_v55 }
  0x3c   :  { %273 = vst [vmem:[#allocation5 + $0x1d0] sm:$0xff] %v209_v56  ;;  %v210_v59 = vsel %vm146_vm11, %v82_v50, 0.0  ;;  %vm147_vm12 = vcmp.gt.f32.partialorder %v83_v52, 0.5  ;;  %vm148_vm13 = vcmp.gt.f32.partialorder %v84_v53, 0.5  ;;  %vm149_vm14 = vcmp.gt.f32.partialorder %v85_v57, 0.5  ;;  %s322_s0 = scalar_lea.vmem %s285_s21, 8192 }
  0x3d   :  { %274 = vst [vmem:[#allocation5 + $0x1d8] sm:$0xff] %v210_v59  ;;  %v211_v60 = vsel %vm147_vm12, %v83_v52, 0.0  ;;  %v212_v61 = vsel %vm148_vm13, %v84_v53, 0.0  ;;  %v213_v62 = vsel %vm149_vm14, %v85_v57, 0.0  ;;  %vm150_vm15 = vcmp.gt.f32.partialorder %v86_v58, 0.5  ;;  %p323_p8 = scmp.ne.s32.totalorder %s285_s21, %s322_s0  ;;  %p328_p10 = scmp.lt.s32.totalorder %s322_s0, %s322_s0 }
  0x3e   :  { %275 = vst [vmem:[#allocation5 + $0x1e0] sm:$0xff] %v211_v60  ;;  %276 = vst [vmem:[#allocation5 + $0x1e8] sm:$0xff] %v212_v61  ;;  %v214_v63 = vsel %vm150_vm15, %v86_v58, 0.0 }
  0x3f   :  { %277 = vst [vmem:[#allocation5 + $0x1f0] sm:$0xff] %v213_v62  ;;  %278 = vst [vmem:[#allocation5 + $0x1f8] sm:$0xff] %v214_v63  ;;  %p329_p11 = por %p328_p10, %p327_p9 }
  0x41   :  { %p330_p12 = pnand %p329_p11, %p323_p8 }
  0x43   :  { %333 = shalt.err (!%p330_p12)
}
  0x44   :  { %s334_s24 = scalar_lea.hbm %s396_s1, 8192 }
  0x45   :  { %p335_p13 = scmp.ne.s32.totalorder %s396_s1, %s334_s24  ;;  %p338_p0 = scmp.lt.u32.totalorder %s334_s24, %s396_s1 }
  0x47   :  { %p340_p1 = pnand %p338_p0, %p335_p13 }
  0x49   :  { %343 = shalt.err (!%p340_p1)
}
  0x4a   :  { %290 = dma.vmem_to_hbm [thread:$0]  %s285_s21, 8192, %s396_s1, [#allocation4], %s349_s16, %s349_s16, %s350_s17  }
  0x4b   :  { %346 = dma.done.wait [#allocation4], 8192  }
  0x4c   :  { %347 = vsyncadd [#allocation4], 4294959104 }
  0x4d   :  { %294 = vsyncpa [#allocation3], 1 }
  0x4e   :  { %295 = vsyncpa [#allocation4], 1 }

</bundles_post_ra>
